<compile_context>
chip_gen: v7x
topology: tpu7x:2x2x1
jax: 0.10.0
libtpu: 0.0.40
codegen_flags: <defaults>
</compile_context>

<pallas_src>
import jax
import jax.numpy as jnp
from jax import lax
from jax.experimental import pallas as pl
from jax.experimental.pallas import tpu as pltpu


def _make_fused_mlp_kernel(n_layers, compute_dtype):
    """Kernel: in-VMEM embedding gather (one-hot MXU) + feature-major MLP."""

    def kernel(idx_ref, u_tbl_ref, i_tbl_ref, *refs):
        # refs = [w0, b0, w1, b1, ..., w_{L-1}, b_{L-1}, o_ref]
        o_ref = refs[-1]
        bt = idx_ref.shape[1]

        def gather_cols(tbl_ref, idx_row):
            # tbl_ref: (E, V_pad) compute_dtype; idx_row: (1, bt) int32.
            # One-hot matmul gather: exact (0/1 weights), lane-dense result,
            # keeps the gathered slab entirely out of HBM.
            v = tbl_ref.shape[1]
            onehot = jnp.where(
                lax.broadcasted_iota(jnp.int32, (v, bt), 0) == idx_row,
                jnp.float32(1.0), jnp.float32(0.0)).astype(compute_dtype)
            return jnp.dot(tbl_ref[...], onehot,
                           preferred_element_type=jnp.float32)   # (E, bt) f32

        u = gather_cols(u_tbl_ref, idx_ref[0:1, :])
        it = gather_cols(i_tbl_ref, idx_ref[1:2, :])
        h = jnp.concatenate([u, it], axis=0)                      # (2E, bt) f32

        for li in range(n_layers):
            w = refs[2 * li][...]                                 # (out, in)
            b = refs[2 * li + 1][...]                             # (out, 1) f32
            h = jnp.dot(w, h.astype(compute_dtype),
                        preferred_element_type=jnp.float32) + b
            if li < n_layers - 1:
                h = jnp.maximum(h, 0.0)                           # ReLU
        o_ref[...] = h.astype(o_ref.dtype)                        # (F_out, bt)

    return kernel


def mlp_fused_pallas(idx, user_tbl_t, item_tbl_t, weights_t, biases, *,
                     batch_tile=8192, compute_dtype=jnp.bfloat16):
    """idx: (2, B) int32 (row 0 = user ids, row 1 = item ids).
    user_tbl_t / item_tbl_t: (E, vocab_pad) compute_dtype (transposed tables).
    weights_t[i]: (F_{i+1}, F_i) compute_dtype.  biases[i]: (F_{i+1}, 1) f32.
    Returns (F_out, B) float32 (F_out == 1 for this module)."""
    _, B = idx.shape
    n_layers = len(weights_t)
    F_out = weights_t[-1].shape[0]

    LANE = 128
    b_ceil = pl.cdiv(B, LANE) * LANE
    bt = max(LANE, (min(int(batch_tile), b_ceil) // LANE) * LANE)
    # Keep >= 2 grid steps when the batch allows it so the "parallel" batch
    # axis can shard across v7x's two TensorCores.
    if b_ceil >= 2 * LANE and bt >= b_ceil:
        bt = max(LANE, ((b_ceil // 2) // LANE) * LANE)
    B_pad = pl.cdiv(B, bt) * bt
    if B_pad != B:
        idx = jnp.pad(idx, ((0, 0), (0, B_pad - B)))   # pad with valid index 0

    kernel = _make_fused_mlp_kernel(n_layers, compute_dtype)

    in_specs = [
        pl.BlockSpec((2, bt), lambda i: (0, i)),                 # ids tile
        pl.BlockSpec(user_tbl_t.shape, lambda i: (0, 0)),        # resident
        pl.BlockSpec(item_tbl_t.shape, lambda i: (0, 0)),        # resident
    ]
    flat_args = [idx.astype(jnp.int32), user_tbl_t, item_tbl_t]
    for w, b in zip(weights_t, biases):
        in_specs.append(pl.BlockSpec(w.shape, lambda i: (0, 0)))
        in_specs.append(pl.BlockSpec(b.shape, lambda i: (0, 0)))
        flat_args += [w, b]

    out_spec = pl.BlockSpec((F_out, bt), lambda i: (0, i))       # lane-dense

    out = pl.pallas_call(
        kernel,
        out_shape=jax.ShapeDtypeStruct((F_out, B_pad), jnp.float32),
        grid_spec=pltpu.PrefetchScalarGridSpec(
            num_scalar_prefetch=0,
            grid=(B_pad // bt,),
            in_specs=in_specs,
            out_specs=out_spec,
        ),
        compiler_params=pltpu.CompilerParams(
            dimension_semantics=("parallel",)),
    )(*flat_args)
    return out[:, :B]


class MLPPallas:
    """JAX/Pallas port of the PyTorch MLP recommender module (eval mode)."""

    def __init__(self, num_users, num_items, embedding_dim, hidden_units,
                 dropout, key, compute_dtype=jnp.bfloat16, batch_tile=8192):
        del dropout  # nn.Dropout is identity in eval mode
        self.compute_dtype = compute_dtype
        self.batch_tile = batch_tile

        dims = [embedding_dim * 2] + list(hidden_units) + [1]
        keys = jax.random.split(key, 2 + 2 * (len(dims) - 1))
        k_iter = iter(keys)

        LANE = 128

        def make_table(k, vocab):
            tbl = 0.1 * jax.random.normal(k, (embedding_dim, vocab), jnp.float32)
            vpad = pl.cdiv(vocab, LANE) * LANE      # lane-align the vocab axis
            tbl = jnp.pad(tbl, ((0, 0), (0, vpad - vocab)))
            return tbl.astype(compute_dtype)        # pre-cast once (bf16)

        # Transposed (E, vocab_pad) tables: column-gather lands directly in
        # the feature-major (F, B) layout the kernel consumes.
        self.user_embed_t = make_table(next(k_iter), num_users + 1)
        self.item_embed_t = make_table(next(k_iter), num_items + 1)

        # nn.Linear orientation (out, in); pre-cast once (bf16 W, f32 b).
        self.weights_t = []
        self.biases = []
        for d_in, d_out in zip(dims[:-1], dims[1:]):
            bound = 1.0 / (d_in ** 0.5)
            w = bound * jax.random.normal(next(k_iter), (d_out, d_in), jnp.float32)
            b = bound * jax.random.normal(next(k_iter), (d_out, 1), jnp.float32)
            self.weights_t.append(w.astype(compute_dtype))
            self.biases.append(b.astype(jnp.float32))

        # jit the whole forward: index stack + pad + fused kernel + slice run
        # as one XLA program (no separate gather/concat/astype HBM passes).
        self._forward = jax.jit(self._forward_impl)

    def _forward_impl(self, user, item):
        idx = jnp.stack([user.astype(jnp.int32), item.astype(jnp.int32)], axis=0)
        out = mlp_fused_pallas(idx, self.user_embed_t, self.item_embed_t,
                               self.weights_t, self.biases,
                               batch_tile=self.batch_tile,
                               compute_dtype=self.compute_dtype)   # (1, B)
        return out[0]                                              # (B,)

    def __call__(self, user, item):
        return self._forward(user, item)

    def reference(self, user, item):
        """Pure-JAX reference using the same bf16/f32 mixed-precision recipe."""
        u = jnp.take(self.user_embed_t, user, axis=1)
        it = jnp.take(self.item_embed_t, item, axis=1)
        h = jnp.concatenate([u, it], axis=0).astype(jnp.float32)
        n = len(self.weights_t)
        for li, (w, b) in enumerate(zip(self.weights_t, self.biases)):
            h = jnp.dot(w, h.astype(self.compute_dtype),
                        preferred_element_type=jnp.float32) + b
            if li < n - 1:
                h = jnp.maximum(h, 0.0)
        return h[0]


if __name__ == "__main__":
    key = jax.random.PRNGKey(0)
    k_model, k_user, k_item = jax.random.split(key, 3)

    num_users, num_items = 10, 20
    embedding_dim = 16
    hidden_units = (32, 16)
    dropout = 0.1
    batch = 16

    model = MLPPallas(num_users, num_items, embedding_dim, hidden_units,
                      dropout, k_model)

    user = jax.random.randint(k_user, (batch,), 0, num_users + 1, jnp.int32)
    item = jax.random.randint(k_item, (batch,), 0, num_items + 1, jnp.int32)

    out = jax.block_until_ready(model(user, item))
    ref = model.reference(user, item)

    assert out.shape == (batch,)
    assert jnp.allclose(out, ref, atol=2e-2, rtol=2e-2), "mismatch vs reference"

    print("KERNEL_OK")
</pallas_src>

<mosaic_0001>
module attributes {stable_mosaic.version = 11 : i64} {
  func.func @kernel(%arg0: i32, %arg1: memref<2x128xi32, #tpu.memory_space<vmem>>, %arg2: memref<16x128xbf16, #tpu.memory_space<vmem>>, %arg3: memref<16x128xbf16, #tpu.memory_space<vmem>>, %arg4: memref<32x32xbf16, #tpu.memory_space<vmem>>, %arg5: memref<32x1xf32, #tpu.memory_space<vmem>>, %arg6: memref<16x32xbf16, #tpu.memory_space<vmem>>, %arg7: memref<16x1xf32, #tpu.memory_space<vmem>>, %arg8: memref<1x16xbf16, #tpu.memory_space<vmem>>, %arg9: memref<1x1xf32, #tpu.memory_space<vmem>>, %arg10: memref<1x128xf32, #tpu.memory_space<vmem>>) attributes {dimension_semantics = [#tpu.dimension_semantics<parallel>], iteration_bounds = array<i64: 1>, scalar_prefetch = 0 : i64, scratch_operands = 0 : i64, tpu.core_type = #tpu.core_type<tc>, window_params = [{transform_indices = @transform_0, window_bounds = array<i64: 2, 128>}, {pipeline_mode = #tpu.pipeline_mode<synchronous>, transform_indices = @transform_1, window_bounds = array<i64: 16, 128>}, {pipeline_mode = #tpu.pipeline_mode<synchronous>, transform_indices = @transform_2, window_bounds = array<i64: 16, 128>}, {pipeline_mode = #tpu.pipeline_mode<synchronous>, transform_indices = @transform_3, window_bounds = array<i64: 32, 32>}, {pipeline_mode = #tpu.pipeline_mode<synchronous>, transform_indices = @transform_4, window_bounds = array<i64: 32, 1>}, {pipeline_mode = #tpu.pipeline_mode<synchronous>, transform_indices = @transform_5, window_bounds = array<i64: 16, 32>}, {pipeline_mode = #tpu.pipeline_mode<synchronous>, transform_indices = @transform_6, window_bounds = array<i64: 16, 1>}, {pipeline_mode = #tpu.pipeline_mode<synchronous>, transform_indices = @transform_7, window_bounds = array<i64: 1, 16>}, {pipeline_mode = #tpu.pipeline_mode<synchronous>, transform_indices = @transform_8, window_bounds = array<i64: 1, 1>}, {transform_indices = @transform_9, window_bounds = array<i64: 1, 128>}]} {
    %c0 = arith.constant 0 : index
    %c0_0 = arith.constant 0 : index
    %0 = vector.load %arg1[%c0, %c0_0] : memref<2x128xi32, #tpu.memory_space<vmem>>, vector<1x128xi32>
    %1 = tpu.iota {dimensions = array<i32: 0>} : vector<128x128xi32>
    %2 = vector.broadcast %0 : vector<1x128xi32> to vector<128x128xi32>
    %3 = arith.cmpi eq, %1, %2 : vector<128x128xi32>
    %cst = arith.constant 1.000000e+00 : f32
    %cst_1 = arith.constant 0.000000e+00 : f32
    %4 = vector.broadcast %cst : f32 to vector<128x128xf32>
    %5 = vector.broadcast %cst_1 : f32 to vector<128x128xf32>
    %6 = arith.select %3, %4, %5 : vector<128x128xi1>, vector<128x128xf32>
    %7 = arith.truncf %6 : vector<128x128xf32> to vector<128x128xbf16>
    %c0_2 = arith.constant 0 : index
    %c0_3 = arith.constant 0 : index
    %8 = vector.load %arg2[%c0_2, %c0_3] : memref<16x128xbf16, #tpu.memory_space<vmem>>, vector<16x128xbf16>
    %cst_4 = arith.constant dense<0.000000e+00> : vector<16x128xf32>
    %9 = tpu.matmul %8, %7, %cst_4 {dimension_numbers = #tpu.dot_dimension_numbers<[1], [0], [0], [1], [0, 0, 1, 1], [], []>} : vector<16x128xbf16>, vector<128x128xbf16>, vector<16x128xf32> -> vector<16x128xf32>
    %c1 = arith.constant 1 : index
    %c0_5 = arith.constant 0 : index
    %10 = vector.load %arg1[%c1, %c0_5] : memref<2x128xi32, #tpu.memory_space<vmem>>, vector<1x128xi32>
    %11 = tpu.iota {dimensions = array<i32: 0>} : vector<128x128xi32>
    %12 = vector.broadcast %10 : vector<1x128xi32> to vector<128x128xi32>
    %13 = arith.cmpi eq, %11, %12 : vector<128x128xi32>
    %cst_6 = arith.constant 1.000000e+00 : f32
    %cst_7 = arith.constant 0.000000e+00 : f32
    %14 = vector.broadcast %cst_6 : f32 to vector<128x128xf32>
    %15 = vector.broadcast %cst_7 : f32 to vector<128x128xf32>
    %16 = arith.select %13, %14, %15 : vector<128x128xi1>, vector<128x128xf32>
    %17 = arith.truncf %16 : vector<128x128xf32> to vector<128x128xbf16>
    %c0_8 = arith.constant 0 : index
    %c0_9 = arith.constant 0 : index
    %18 = vector.load %arg3[%c0_8, %c0_9] : memref<16x128xbf16, #tpu.memory_space<vmem>>, vector<16x128xbf16>
    %cst_10 = arith.constant dense<0.000000e+00> : vector<16x128xf32>
    %19 = tpu.matmul %18, %17, %cst_10 {dimension_numbers = #tpu.dot_dimension_numbers<[1], [0], [0], [1], [0, 0, 1, 1], [], []>} : vector<16x128xbf16>, vector<128x128xbf16>, vector<16x128xf32> -> vector<16x128xf32>
    %20 = tpu.concatenate %9, %19 in 0 : vector<16x128xf32>, vector<16x128xf32> -> vector<32x128xf32>
    %c0_11 = arith.constant 0 : index
    %c0_12 = arith.constant 0 : index
    %21 = vector.load %arg4[%c0_11, %c0_12] : memref<32x32xbf16, #tpu.memory_space<vmem>>, vector<32x32xbf16>
    %c0_13 = arith.constant 0 : index
    %c0_14 = arith.constant 0 : index
    %22 = vector.load %arg5[%c0_13, %c0_14] : memref<32x1xf32, #tpu.memory_space<vmem>>, vector<32x1xf32>
    %23 = arith.truncf %20 : vector<32x128xf32> to vector<32x128xbf16>
    %cst_15 = arith.constant dense<0.000000e+00> : vector<32x128xf32>
    %24 = tpu.matmul %21, %23, %cst_15 {dimension_numbers = #tpu.dot_dimension_numbers<[1], [0], [0], [1], [0, 0, 1, 1], [], []>} : vector<32x32xbf16>, vector<32x128xbf16>, vector<32x128xf32> -> vector<32x128xf32>
    %25 = vector.broadcast %22 : vector<32x1xf32> to vector<32x128xf32>
    %26 = arith.addf %24, %25 : vector<32x128xf32>
    %cst_16 = arith.constant 0.000000e+00 : f32
    %27 = vector.broadcast %cst_16 : f32 to vector<32x128xf32>
    %28 = arith.maximumf %26, %27 : vector<32x128xf32>
    %c0_17 = arith.constant 0 : index
    %c0_18 = arith.constant 0 : index
    %29 = vector.load %arg6[%c0_17, %c0_18] : memref<16x32xbf16, #tpu.memory_space<vmem>>, vector<16x32xbf16>
    %c0_19 = arith.constant 0 : index
    %c0_20 = arith.constant 0 : index
    %30 = vector.load %arg7[%c0_19, %c0_20] : memref<16x1xf32, #tpu.memory_space<vmem>>, vector<16x1xf32>
    %31 = arith.truncf %28 : vector<32x128xf32> to vector<32x128xbf16>
    %cst_21 = arith.constant dense<0.000000e+00> : vector<16x128xf32>
    %32 = tpu.matmul %29, %31, %cst_21 {dimension_numbers = #tpu.dot_dimension_numbers<[1], [0], [0], [1], [0, 0, 1, 1], [], []>} : vector<16x32xbf16>, vector<32x128xbf16>, vector<16x128xf32> -> vector<16x128xf32>
    %33 = vector.broadcast %30 : vector<16x1xf32> to vector<16x128xf32>
    %34 = arith.addf %32, %33 : vector<16x128xf32>
    %cst_22 = arith.constant 0.000000e+00 : f32
    %35 = vector.broadcast %cst_22 : f32 to vector<16x128xf32>
    %36 = arith.maximumf %34, %35 : vector<16x128xf32>
    %c0_23 = arith.constant 0 : index
    %c0_24 = arith.constant 0 : index
    %37 = vector.load %arg8[%c0_23, %c0_24] : memref<1x16xbf16, #tpu.memory_space<vmem>>, vector<1x16xbf16>
    %c0_25 = arith.constant 0 : index
    %c0_26 = arith.constant 0 : index
    %38 = vector.load %arg9[%c0_25, %c0_26] : memref<1x1xf32, #tpu.memory_space<vmem>>, vector<1x1xf32>
    %39 = arith.truncf %36 : vector<16x128xf32> to vector<16x128xbf16>
    %cst_27 = arith.constant dense<0.000000e+00> : vector<1x128xf32>
    %40 = tpu.matmul %37, %39, %cst_27 {dimension_numbers = #tpu.dot_dimension_numbers<[1], [0], [0], [1], [0, 0, 1, 1], [], []>} : vector<1x16xbf16>, vector<16x128xbf16>, vector<1x128xf32> -> vector<1x128xf32>
    %41 = vector.broadcast %38 : vector<1x1xf32> to vector<1x128xf32>
    %42 = arith.addf %40, %41 : vector<1x128xf32>
    %c0_28 = arith.constant 0 : index
    %c0_29 = arith.constant 0 : index
    %43 = vector.load %arg10[%c0_28, %c0_29] : memref<1x128xf32, #tpu.memory_space<vmem>>, vector<1x128xf32>
    tpu.vector_store %arg10[%c0_28, %c0_29], %42 {strides = array<i32>} : memref<1x128xf32, #tpu.memory_space<vmem>>, vector<1x128xf32>,
    return
  }
  func.func @transform_0(%arg0: i32) -> (i32, i32) {
    %c0_i32 = arith.constant 0 : i32
    %c0_i32_0 = arith.constant 0 : i32
    return %c0_i32, %arg0 : i32, i32
  }
  func.func @transform_1(%arg0: i32) -> (i32, i32) {
    %c0_i32 = arith.constant 0 : i32
    %c0_i32_0 = arith.constant 0 : i32
    %c0_i32_1 = arith.constant 0 : i32
    return %c0_i32, %c0_i32_0 : i32, i32
  }
  func.func @transform_2(%arg0: i32) -> (i32, i32) {
    %c0_i32 = arith.constant 0 : i32
    %c0_i32_0 = arith.constant 0 : i32
    %c0_i32_1 = arith.constant 0 : i32
    return %c0_i32, %c0_i32_0 : i32, i32
  }
  func.func @transform_3(%arg0: i32) -> (i32, i32) {
    %c0_i32 = arith.constant 0 : i32
    %c0_i32_0 = arith.constant 0 : i32
    %c0_i32_1 = arith.constant 0 : i32
    return %c0_i32, %c0_i32_0 : i32, i32
  }
  func.func @transform_4(%arg0: i32) -> (i32, i32) {
    %c0_i32 = arith.constant 0 : i32
    %c0_i32_0 = arith.constant 0 : i32
    %c0_i32_1 = arith.constant 0 : i32
    return %c0_i32, %c0_i32_0 : i32, i32
  }
  func.func @transform_5(%arg0: i32) -> (i32, i32) {
    %c0_i32 = arith.constant 0 : i32
    %c0_i32_0 = arith.constant 0 : i32
    %c0_i32_1 = arith.constant 0 : i32
    return %c0_i32, %c0_i32_0 : i32, i32
  }
  func.func @transform_6(%arg0: i32) -> (i32, i32) {
    %c0_i32 = arith.constant 0 : i32
    %c0_i32_0 = arith.constant 0 : i32
    %c0_i32_1 = arith.constant 0 : i32
    return %c0_i32, %c0_i32_0 : i32, i32
  }
  func.func @transform_7(%arg0: i32) -> (i32, i32) {
    %c0_i32 = arith.constant 0 : i32
    %c0_i32_0 = arith.constant 0 : i32
    %c0_i32_1 = arith.constant 0 : i32
    return %c0_i32, %c0_i32_0 : i32, i32
  }
  func.func @transform_8(%arg0: i32) -> (i32, i32) {
    %c0_i32 = arith.constant 0 : i32
    %c0_i32_0 = arith.constant 0 : i32
    %c0_i32_1 = arith.constant 0 : i32
    return %c0_i32, %c0_i32_0 : i32, i32
  }
  func.func @transform_9(%arg0: i32) -> (i32, i32) {
    %c0_i32 = arith.constant 0 : i32
    %c0_i32_0 = arith.constant 0 : i32
    return %c0_i32, %arg0 : i32, i32
  }
}

</mosaic_0001>

<bundles_post_ra>
// kernel: _forward_impl.1
= control target key start
LH: loop header
LB: loop body
LE: loop exit
PB: predicated region body
PF: predicated region fallthrough
CT: control target
= control target key end

     0   :  { %s973_s0 = inlined_call_operand.vmem [shape: s32[2,128], index: 0, kind: input, shape index: {}]   ;;  %s974_s1 = inlined_call_operand.hbm [shape: bf16[16,128], index: 1, kind: input, shape index: {}]   ;;  %s975_s2 = inlined_call_operand.hbm [shape: bf16[16,128], index: 2, kind: input, shape index: {}]   ;;  %s976_s3 = inlined_call_operand.vmem [shape: bf16[32,32], index: 3, kind: input, shape index: {}]   ;;  %s977_s4 = inlined_call_operand.vmem [shape: f32[32,1], index: 4, kind: input, shape index: {}]   ;;  %s978_s5 = inlined_call_operand.vmem [shape: bf16[16,32], index: 5, kind: input, shape index: {}]   ;;  %s979_s6 = inlined_call_operand.hbm [shape: f32[16,1], index: 6, kind: input, shape index: {}]   ;;  %s980_s7 = inlined_call_operand.vmem [shape: bf16[1,16], index: 7, kind: input, shape index: {}]   ;;  %s981_s8 = inlined_call_operand.<no memory space> [shape: f32[1,1], index: 8, kind: input, shape index: {}]   ;;  %s982_s9 = inlined_call_operand.vmem [shape: f32[1,128], index: 9, kind: output, shape index: {}]  }
   0x1   :  { %v14_v0 = vstv %s981_s8 }
   0x2   :  { %15 = vst [vmem:[#allocation2] sm:$0x1] %v14_v0 }
   0x3   :  { %16 = vsyncpa [#allocation4], 0 }
   0x4   :  { %17 = vsyncpa [#allocation6], 0  ;;  %s731_s11 = smov [#allocation5]   ;;  %s732_s13 = smov [#allocation3]  }
   0x5   :  { %s37_s12 = sshll.u32 %s731_s11, 4  ;;  %s25_s14 = sshll.u32 %s732_s13, 4  ;;  %s38_s12 = int_to_ptr.vmem [resolvable:$true] %s37_s12  ;;  %s795_s14 = int_to_ptr.vmem [resolvable:$true] %s25_s14 }
   0x6   :  { %s661_s17 = scalar_lea.hbm %s975_s2, 128 }
   0x7   :  { %p662_p0 = scmp.ne.s32.totalorder %s975_s2, %s661_s17  ;;  %p665_p1 = scmp.lt.u32.totalorder %s661_s17, %s975_s2 }
   0x9   :  { %p667_p2 = pnand %p665_p1, %p662_p0 }
   0xb   :  { %670 = shalt.err (!%p667_p2)
}
   0xc   :  { %s671_s21 = scalar_lea.vmem %s38_s12, 128  ;;  %p676_p4 = scmp.lt.s32.totalorder %s38_s12, %s38_s12 }
   0xd   :  { %p672_p3 = scmp.ne.s32.totalorder %s38_s12, %s671_s21  ;;  %p677_p5 = scmp.lt.s32.totalorder %s671_s21, %s671_s21 }
   0xf   :  { %p678_p6 = por %p677_p5, %p676_p4 }
  0x11   :  { %p679_p7 = pnand %p678_p6, %p672_p3 }
  0x13   :  { %682 = shalt.err (!%p679_p7)
}
  0x14   :  { %s733_s22 = smov 64   ;;  %s734_s23 = smov 4  }
  0x15   :  { %43 = dma.hbm_to_vmem [thread:$0]  %s975_s2, 128, %s38_s12, [#allocation6], %s733_s22, %s733_s22, %s734_s23  }
  0x16   :  { %s683_s28 = scalar_lea.hbm %s974_s1, 128 }
  0x17   :  { %p684_p8 = scmp.ne.s32.totalorder %s974_s1, %s683_s28  ;;  %p687_p9 = scmp.lt.u32.totalorder %s683_s28, %s974_s1 }
  0x19   :  { %p689_p10 = pnand %p687_p9, %p684_p8 }
  0x1b   :  { %692 = shalt.err (!%p689_p10)
}
  0x1c   :  { %s693_s13 = scalar_lea.vmem %s795_s14, 128  ;;  %p698_p12 = scmp.lt.s32.totalorder %s795_s14, %s795_s14 }
  0x1d   :  { %p694_p11 = scmp.ne.s32.totalorder %s795_s14, %s693_s13  ;;  %p699_p13 = scmp.lt.s32.totalorder %s693_s13, %s693_s13 }
  0x1f   :  { %p700_p0 = por %p699_p13, %p698_p12 }
  0x21   :  { %p701_p1 = pnand %p700_p0, %p694_p11 }
  0x23   :  { %704 = shalt.err (!%p701_p1)
}
  0x24   :  { %31 = dma.hbm_to_vmem [thread:$0]  %s974_s1, 128, %s795_s14, [#allocation4], %s733_s22, %s733_s22, %s734_s23  }
  0x25   :  { %s735_s15 = smov [#allocation7]   ;;  %s705_s19 = scalar_lea.hbm %s979_s6, 256 }
  0x26   :  { %s55_s16 = sshll.u32 %s735_s15, 4  ;;  %p706_p2 = scmp.ne.s32.totalorder %s979_s6, %s705_s19  ;;  %s56_s16 = int_to_ptr.vmem [resolvable:$true] %s55_s16 }
  0x27   :  { %p709_p3 = scmp.lt.u32.totalorder %s705_s19, %s979_s6 }
  0x29   :  { %p711_p4 = pnand %p709_p3, %p706_p2 }
  0x2b   :  { %714 = shalt.err (!%p711_p4)
}
  0x2c   :  { %s715_s25 = scalar_lea.vmem %s56_s16, 256  ;;  %p720_p6 = scmp.lt.s32.totalorder %s56_s16, %s56_s16 }
  0x2d   :  { %p716_p5 = scmp.ne.s32.totalorder %s56_s16, %s715_s25  ;;  %p721_p7 = scmp.lt.s32.totalorder %s715_s25, %s715_s25 }
  0x2f   :  { %p722_p8 = por %p721_p7, %p720_p6 }
  0x31   :  { %p723_p9 = pnand %p722_p8, %p716_p5 }
  0x33   :  { %726 = shalt.err (!%p723_p9)
}
  0x34   :  { %s736_s1 = smov 128   ;;  %s737_s14 = smov 8  }
  0x35   :  { %61 = dma.hbm_to_vmem [thread:$0]  %s979_s6, 256, %s56_s16, [#allocation6], %s736_s1, %s736_s1, %s737_s14  }
  0x36   :  { %727 = dma.done.wait [#allocation4], 128  }
  0x37   :  { %728 = vsyncadd [#allocation4], 4294967168 }
  0x38   :  { %729 = dma.done.wait [#allocation6], 384  }
  0x39   :  { %730 = vsyncadd [#allocation6], 4294966912  ;;  %v77_v1 = vlaneseq  ;;  %v738_v2 = vmov 0.0   ;;  %vm739_vm0 = vmmov 0   ;;  %v852_v7 = vld [vmem:[%s973_s0] ss:$0 sm:$0xff] }
  0x3a   :  { %581 = vmatprep.subr.bf16.mxu0 %v738_v2  ;;  %601 = vmatprep.subr.bf16.mxu1 %v738_v2  ;;  %v857_v8 = vld [vmem:[%s973_s0 + $0x1] ss:$0 sm:$0xff]  ;;  %v740_v11 = vmov 1.0|1.0   ;;  %v657_v23 = vld [vmem:[#allocation5] sm:$0xff]   ;;  %v741_v27 = vmov 0  }
  0x3b   :  { %v840_v3 = vshrl.u32 %v77_v1, 7  ;;  %597 = vmatprep.mubr.msk.bf16.mxu0 %vm739_vm0, %v738_v2  ;;  %617 = vmatprep.mubr.msk.bf16.mxu1 %vm739_vm0, %v738_v2  ;;  %v656_v22 = vld [vmem:[#allocation3] sm:$0xff]   ;;  %v287_v26 = vld [vmem:[%s977_s4 + $0x10] sm:$0xff]  ;;  %v288_v29 = vld [vmem:[%s977_s4 + $0x18] sm:$0xff] }
  0x3c   :  { %v658_v24 = vld [vmem:[%s976_s3] sm:$0xff]   ;;  %654 = vset.pattern.permute.xlu0 %v741_v27  ;;  %655 = vset.pattern.permute.xlu1 %v741_v27  ;;  %v286_v28 = vld [vmem:[%s977_s4 + $0x8] sm:$0xff]  ;;  %v383_v30 = vld [vmem:[#allocation7] sm:$0xff] }
  0x3d   :  { %v79_v4 = vadd.s32 8, %v840_v3  ;;  %v80_v5 = vadd.s32 16, %v840_v3  ;;  %v81_v6 = vadd.s32 24, %v840_v3  ;;  %v82_v9 = vadd.s32 32, %v840_v3  ;;  %v285_v25 = vld [vmem:[%s977_s4] sm:$0xff]  ;;  %303 = vperm.xlu1 %655, %v287_v26   ;;  %v659_v43 = vld [vmem:[%s976_s3 + $0x8] sm:$0xff]  }
  0x3e   :  { %v83_v10 = vadd.s32 40, %v840_v3  ;;  %vm98_vm1 = vcmp.eq.s32.totalorder %v840_v3, %v852_v7  ;;  %vm192_vm3 = vcmp.eq.s32.totalorder %v840_v3, %v857_v8  ;;  %v84_v12 = vadd.s32 48, %v840_v3  ;;  %293 = vperm.xlu0 %654, %v285_v25   ;;  %v384_v31 = vld [vmem:[#allocation7 + $0x8] sm:$0xff] }
  0x3f   :  { %vm99_vm2 = vcmp.eq.s32.totalorder %v79_v4, %v852_v7  ;;  %vm193_vm4 = vcmp.eq.s32.totalorder %v79_v4, %v857_v8  ;;  %vm100_vm6 = vcmp.eq.s32.totalorder %v80_v5, %v852_v7  ;;  %vm101_vm7 = vcmp.eq.s32.totalorder %v81_v6, %v852_v7  ;;  %v449_v32 = vld [vmem:[#allocation2] sm:$0x1] }
  0x40   :  { %vm513_vm5 = vmpackc.low %vm99_vm2, %vm98_vm1  ;;  %vm194_vm8 = vcmp.eq.s32.totalorder %v80_v5, %v857_v8  ;;  %vm195_vm9 = vcmp.eq.s32.totalorder %v81_v6, %v857_v8  ;;  %vm102_vm13 = vcmp.eq.s32.totalorder %v82_v9, %v852_v7  ;;  %vm103_vm14 = vcmp.eq.s32.totalorder %v83_v10, %v852_v7  ;;  %v660_v62 = vld [vmem:[%s978_s5] sm:$0xff]  }
  0x41   :  { %582 = vmatpush3.bf16.msk.msra.mxu0 %vm513_vm5, %v740_v11  ;;  %vm531_vm10 = vmpackc.low %vm193_vm4, %vm192_vm3  ;;  %v85_v13 = vadd.s32 56, %v840_v3  ;;  %vm196_vm15 = vcmp.eq.s32.totalorder %v82_v9, %v857_v8  ;;  %vm197_vm1 = vcmp.eq.s32.totalorder %v83_v10, %v857_v8  ;;  %vm104_vm4 = vcmp.eq.s32.totalorder %v84_v12, %v852_v7  ;;  %308 = vperm.xlu1 %655, %v288_v29  }
  0x42   :  { %602 = vmatpush3.bf16.msk.msra.mxu1 %vm531_vm10, %v740_v11  ;;  %583 = vmatprep.subr.bf16.mxu0 %v738_v2  ;;  %vm515_vm11 = vmpackc.low %vm101_vm7, %vm100_vm6  ;;  %v86_v14 = vadd.s32 64, %v840_v3  ;;  %v87_v15 = vadd.s32 72, %v840_v3  ;;  %vm198_vm6 = vcmp.eq.s32.totalorder %v84_v12, %v857_v8  ;;  %v88_v16 = vadd.s32 80, %v840_v3 }
  0x43   :  { %603 = vmatprep.subr.bf16.mxu1 %v738_v2  ;;  %vm533_vm12 = vmpackc.low %vm195_vm9, %vm194_vm8  ;;  %vm105_vm5 = vcmp.eq.s32.totalorder %v85_v13, %v852_v7  ;;  %vm199_vm7 = vcmp.eq.s32.totalorder %v85_v13, %v857_v8  ;;  %v89_v17 = vadd.s32 88, %v840_v3  ;;  %v90_v18 = vadd.s32 96, %v840_v3  ;;  %298 = vperm.xlu0 %654, %v286_v28  }
  0x44   :  { %vm517_vm2 = vmpackc.low %vm103_vm14, %vm102_vm13  ;;  %vm106_vm10 = vcmp.eq.s32.totalorder %v86_v14, %v852_v7  ;;  %vm201_vm13 = vcmp.eq.s32.totalorder %v87_v15, %v857_v8  ;;  %v91_v19 = vadd.s32 104, %v840_v3  ;;  %v92_v20 = vadd.s32 112, %v840_v3 }
  0x45   :  { %584 = vmatpush3.bf16.msk.msra.mxu0 %vm515_vm11, %v740_v11  ;;  %vm535_vm3 = vmpackc.low %vm197_vm1, %vm196_vm15  ;;  %vm107_vm11 = vcmp.eq.s32.totalorder %v87_v15, %v852_v7  ;;  %vm108_vm1 = vcmp.eq.s32.totalorder %v88_v16, %v852_v7  ;;  %v93_v21 = vadd.s32 120, %v840_v3  ;;  %394 = vperm.xlu1 %655, %v384_v31   ;;  %v458_v12 = vsub.s32 0, %v840_v3 }
  0x46   :  { %604 = vmatpush3.bf16.msk.msra.mxu1 %vm533_vm12, %v740_v11  ;;  %585 = vmatprep.subr.bf16.mxu0 %v738_v2  ;;  %vm519_vm8 = vmpackc.low %vm105_vm5, %vm104_vm4  ;;  %vm200_vm12 = vcmp.eq.s32.totalorder %v86_v14, %v857_v8  ;;  %vm203_vm4 = vcmp.eq.s32.totalorder %v89_v17, %v857_v8 }
  0x47   :  { %605 = vmatprep.subr.bf16.mxu1 %v738_v2  ;;  %vm537_vm9 = vmpackc.low %vm199_vm7, %vm198_vm6  ;;  %vm110_vm7 = vcmp.eq.s32.totalorder %v90_v18, %v852_v7  ;;  %389 = vperm.xlu0 %654, %v383_v30  }
  0x48   :  { %vm521_vm14 = vmpackc.low %vm107_vm11, %vm106_vm10  ;;  %vm205_vm10 = vcmp.eq.s32.totalorder %v91_v19, %v857_v8 }
  0x49   :  { %586 = vmatpush3.bf16.msk.msra.mxu0 %vm517_vm2, %v740_v11  ;;  %vm539_vm15 = vmpackc.low %vm201_vm13, %vm200_vm12  ;;  %vm109_vm2 = vcmp.eq.s32.totalorder %v89_v17, %v852_v7  ;;  %vm112_vm13 = vcmp.eq.s32.totalorder %v92_v20, %v852_v7 }
  0x4a   :  { %606 = vmatpush3.bf16.msk.msra.mxu1 %vm535_vm3, %v740_v11  ;;  %587 = vmatprep.subr.bf16.mxu0 %v738_v2  ;;  %vm202_vm3 = vcmp.eq.s32.totalorder %v88_v16, %v857_v8  ;;  %vm523_vm5 = vmpackc.low %vm109_vm2, %vm108_vm1  ;;  %vm207_vm1 = vcmp.eq.s32.totalorder %v93_v21, %v857_v8 }
  0x4b   :  { %607 = vmatprep.subr.bf16.mxu1 %v738_v2  ;;  %vm541_vm6 = vmpackc.low %vm203_vm4, %vm202_vm3  ;;  %vm321_vm4 = vcmask 261120   ;;  %453 = vperm.xlu0 %654, %v449_v32  }
  0x4d   :  { %588 = vmatpush3.bf16.msk.msra.mxu0 %vm519_vm8, %v740_v11  ;;  %vm111_vm8 = vcmp.eq.s32.totalorder %v91_v19, %v852_v7 }
  0x4e   :  { %608 = vmatpush3.bf16.msk.msra.mxu1 %vm537_vm9, %v740_v11  ;;  %589 = vmatprep.subr.bf16.mxu0 %v738_v2  ;;  %vm204_vm9 = vcmp.eq.s32.totalorder %v90_v18, %v857_v8  ;;  %vm525_vm11 = vmpackc.low %vm111_vm8, %vm110_vm7 }
  0x4f   :  { %609 = vmatprep.subr.bf16.mxu1 %v738_v2  ;;  %vm543_vm12 = vmpackc.low %vm205_vm10, %vm204_vm9 }
  0x51   :  { %590 = vmatpush3.bf16.msk.msra.mxu0 %vm521_vm14, %v740_v11  ;;  %vm113_vm14 = vcmp.eq.s32.totalorder %v93_v21, %v852_v7 }
  0x52   :  { %610 = vmatpush3.bf16.msk.msra.mxu1 %vm539_vm15, %v740_v11  ;;  %591 = vmatprep.subr.bf16.mxu0 %v738_v2  ;;  %vm206_vm15 = vcmp.eq.s32.totalorder %v92_v20, %v857_v8  ;;  %vm527_vm2 = vmpackc.low %vm113_vm14, %vm112_vm13 }
  0x53   :  { %611 = vmatprep.subr.bf16.mxu1 %v738_v2  ;;  %vm545_vm3 = vmpackc.low %vm207_vm1, %vm206_vm15 }
  0x55   :  { %592 = vmatpush3.bf16.msk.msra.mxu0 %vm523_vm5, %v740_v11 }
  0x56   :  { %612 = vmatpush3.bf16.msk.msra.mxu1 %vm541_vm6, %v740_v11  ;;  %593 = vmatprep.subr.bf16.mxu0 %v738_v2 }
  0x57   :  { %613 = vmatprep.subr.bf16.mxu1 %v738_v2 }
  0x59   :  { %594 = vmatpush3.bf16.msk.msra.mxu0 %vm525_vm11, %v740_v11 }
  0x5a   :  { %614 = vmatpush3.bf16.msk.msra.mxu1 %vm543_vm12, %v740_v11  ;;  %595 = vmatprep.subr.bf16.mxu0 %v738_v2 }
  0x5b   :  { %615 = vmatprep.subr.bf16.mxu1 %v738_v2 }
  0x5d   :  { %596 = vmatpush3.bf16.msk.msra.mxu0 %vm527_vm2, %v740_v11 }
  0x5e   :  { %616 = vmatpush3.bf16.msk.msra.mxu1 %vm545_vm3, %v740_v11 }
  0x5f   :  { %629 = vmatprep.subr.bf16.mxu1 %v738_v2 }
  0x60   :  { %598 = vmatmul.mubr.bf16.vlgmr.msra.gmra.mrb[0].mxu0 %v656_v22 }
  0x61   :  { %618 = vmatmul.mubr.bf16.vlgmr.msra.gmra.mrb[0].mxu1 %v657_v23  ;;  %625 = vmatprep.mubr.msk.bf16.mxu0 %vm321_vm4, %v658_v24 }
  0x62   :  { %633 = vmatprep.mubr.msk.bf16.mxu1 %vm739_vm0, %v738_v2 }
  0xbc   :  { %v304_v44 = vpop.permute.xlu1 %303 }
  0xbd   :  { %v294_v45 = vpop.permute.xlu0 %293 }
  0xc0   :  { %v309_v49 = vpop.permute.xlu1 %308 }
  0xc2   :  { %v299_v52 = vpop.permute.xlu0 %298 }
  0xc4   :  { %v395_v5 = vpop.permute.xlu1 %394 }
  0xc6   :  { %v390_v63 = vpop.permute.xlu0 %389 }
  0xca   :  { %v454_v13 = vpop.permute.xlu0 %453 }
  0xcb   :  { %v459_v14 = vrot.slane %v454_v13, %v458_v12 }
 0x133   :  { %v180_v33 = vpop.f32.mrb[0].mxu0 }
 0x134   :  { %v599_v34 = vpop.f32.mrb[1].mxu0  ;;  %v274_v35 = vpop.f32.mrb[0].mxu1 }
 0x135   :  { %v183_v36 = vpop.f32.mrb[2].mxu0  ;;  %v619_v37 = vpop.f32.mrb[1].mxu1 }
 0x136   :  { %v289_v38 = vpack.c.bf16 %v183_v36, %v180_v33  ;;  %v600_v39 = vpop.f32.mrb[3].mxu0  ;;  %v277_v40 = vpop.f32.mrb[2].mxu1 }
 0x137   :  { %v290_v41 = vpack.c.bf16 %v277_v40, %v274_v35  ;;  %v620_v42 = vpop.f32.mrb[3].mxu1 }
 0x138   :  { %621 = vmatprep.subr.bf16.mxu0 %v289_v38 }
 0x139   :  { %622 = vmatpush3.bf16.msra.mxu0 %v289_v38 }
 0x13a   :  { %623 = vmatprep.subr.bf16.mxu0 %v290_v41 }
 0x13d   :  { %624 = vmatpush3.bf16.msra.mxu0 %v290_v41 }
 0x13e   :  { %637 = vmatprep.subr.bf16.mxu0 %v738_v2 }
 0x140   :  { %626 = vmatmul.mubr.msk.bf16.vlgmr.msra.gmra.mrb[4].mxu0 %vm321_vm4, %v659_v43 }
 0x141   :  { %639 = vmatprep.mubr.msk.bf16.mxu0 %vm739_vm0, %v738_v2  ;;  %vm460_vm0 = vcmask 130048  }
 0x213   :  { %v627_v46 = vpop.f32.mrb[4].mxu0 }
 0x214   :  { %v371_v47 = vadd.f32 %v627_v46, %v304_v44  ;;  %v362_v48 = vpop.f32.mrb[5].mxu0 }
 0x215   :  { %v363_v50 = vadd.f32 %v362_v48, %v294_v45  ;;  %v628_v51 = vpop.f32.mrb[6].mxu0 }
 0x216   :  { %v374_v53 = vadd.f32 %v628_v51, %v309_v49  ;;  %v365_v54 = vpop.f32.mrb[7].mxu0  ;;  %v379_v56 = vmax.f32 %v371_v47, 0.0 }
 0x217   :  { %v366_v55 = vadd.f32 %v365_v54, %v299_v52  ;;  %v377_v58 = vmax.f32 %v363_v50, 0.0 }
 0x218   :  { %v380_v57 = vmax.f32 %v374_v53, 0.0 }
 0x219   :  { %v378_v59 = vmax.f32 %v366_v55, 0.0 }
 0x21a   :  { %v386_v60 = vpack.c.bf16 %v380_v57, %v379_v56 }
 0x21b   :  { %v385_v61 = vpack.c.bf16 %v378_v59, %v377_v58 }
 0x21d   :  { %630 = vmatpush3.bf16.msra.mxu1 %v385_v61 }
 0x21e   :  { %631 = vmatprep.subr.bf16.mxu1 %v738_v2  ;;  %v448_v2 = vld [vmem:[%s980_s7] sm:$0x1] }
 0x221   :  { %632 = vmatpush3.bf16.msra.mxu1 %v386_v60 }
 0x224   :  { %634 = vmatmul.mubr.msk.bf16.vlgmr.msra.gmra.mrb[4].mxu1 %vm321_vm4, %v660_v62 }
 0x2f7   :  { %v439_v0 = vpop.f32.mrb[4].mxu1 }
 0x2f8   :  { %v440_v1 = vadd.f32 %v439_v0, %v390_v63  ;;  %v635_v4 = vpop.f32.mrb[5].mxu1 }
 0x2f9   :  { %v442_v6 = vpop.f32.mrb[6].mxu1 }
 0x2fa   :  { %v443_v7 = vadd.f32 %v442_v6, %v395_v5  ;;  %v636_v8 = vpop.f32.mrb[7].mxu1  ;;  %v446_v9 = vmax.f32 %v440_v1, 0.0 }
 0x2fc   :  { %v447_v10 = vmax.f32 %v443_v7, 0.0 }
 0x2fe   :  { %v450_v11 = vpack.c.bf16 %v447_v10, %v446_v9 }
 0x300   :  { %638 = vmatpush3.bf16.msra.mxu0 %v450_v11 }
 0x303   :  { %640 = vmatmul.mubr.msk.bf16.vlgmr.msra.gmra.mrb[8].mxu0 %vm460_vm0, %v448_v2 }
 0x3d6   :  { %v498_v15 = vpop.f32.mrb[8].mxu0 }
 0x3d7   :  { %v499_v16 = vadd.f32 %v498_v15, %v459_v14  ;;  %v641_v17 = vpop.f32.mrb[9].mxu0 }
 0x3d8   :  { %v501_v18 = vpop.f32.mrb[10].mxu0 }
 0x3d9   :  { %504 = vst [vmem:[%s982_s9] sm:$0x1] %v499_v16  ;;  %v642_v19 = vpop.f32.mrb[11].mxu0 }
 0x3da   :  { %509 = vsyncpa [#allocation4], 1 }
 0x3db   :  { %510 = vsyncpa [#allocation6], 1 }

</bundles_post_ra>
